<compile_context>
chip_gen: v7x
topology: tpu7x:2x2x1
jax: 0.10.0
libtpu: 0.0.40
codegen_flags: <defaults>
</compile_context>

<pallas_src>
import functools

import jax
import jax.numpy as jnp
from jax import lax
from jax.experimental import pallas as pl
from jax.experimental.pallas import tpu as pltpu


# ----------------------------------------------------------------------------
# Kernel 1: batched per-head projection + attention logits (all heads at once)
# grid = (N // TM,) over node-row tiles.
# ----------------------------------------------------------------------------
def _gat_project_kernel(x_ref, w_ref, asrc_m_ref, adst_m_ref,
                        xw_ref, asrcT_ref, adst_ref):
    # x_ref:      (TM, Fin)      node-feature row tile
    # w_ref:      (Fin, H*C)     all head weights, packed lane-dense
    # asrc_m_ref: (H, H*C)       block-diagonal a_src (row h nonzero only in head-h cols)
    # adst_m_ref: (H, H*C)       block-diagonal a_dst
    # xw_ref:     (TM, H*C) bf16 projected features (lane-dense, all heads)
    # asrcT_ref:  (H, TM)   f32  alpha_src per head, src nodes on the lane axis
    # adst_ref:   (TM, H)   f32  alpha_dst per head
    xw = jnp.dot(x_ref[...], w_ref[...], preferred_element_type=jnp.float32)
    xw_ref[...] = xw.astype(xw_ref.dtype)
    # alpha_dst[n, h] = <xw_head_h[n], a_dst_h>   (one batched dot over H*C)
    adst_ref[...] = lax.dot_general(
        xw, adst_m_ref[...], (((1,), (1,)), ((), ())),
        preferred_element_type=jnp.float32)
    # alpha_src^T[h, n] = <xw_head_h[n], a_src_h>
    asrcT_ref[...] = lax.dot_general(
        asrc_m_ref[...], xw, (((1,), (1,)), ((), ())),
        preferred_element_type=jnp.float32)


def _gat_project(x, w_all, a_src_mat, a_dst_mat, tm):
    n, fin = x.shape
    hc = w_all.shape[1]
    nh = a_src_mat.shape[0]
    return pl.pallas_call(
        _gat_project_kernel,
        out_shape=(jax.ShapeDtypeStruct((n, hc), jnp.bfloat16),
                   jax.ShapeDtypeStruct((nh, n), jnp.float32),
                   jax.ShapeDtypeStruct((n, nh), jnp.float32)),
        grid=(n // tm,),
        in_specs=[pl.BlockSpec((tm, fin), lambda i: (i, 0)),
                  pl.BlockSpec((fin, hc), lambda i: (0, 0)),
                  pl.BlockSpec((nh, hc), lambda i: (0, 0)),
                  pl.BlockSpec((nh, hc), lambda i: (0, 0))],
        out_specs=(pl.BlockSpec((tm, hc), lambda i: (i, 0)),
                   pl.BlockSpec((nh, tm), lambda i: (0, i)),
                   pl.BlockSpec((tm, nh), lambda i: (i, 0))),
        compiler_params=pltpu.CompilerParams(
            dimension_semantics=("parallel",)),
    )(x, w_all, a_src_mat, a_dst_mat)


# ----------------------------------------------------------------------------
# Kernel 2: edge-attention softmax + aggregation for ALL heads over one resident
#           (TM, N) adjacency tile, with the layer epilogue fused in.
# grid = (N // TM,) over destination-row tiles.
# ----------------------------------------------------------------------------
def _gat_attn_kernel(xw_ref, asrcT_ref, adst_ref, adj_ref, b_ref, out_ref,
                     *, heads, c_out, concat):
    # xw_ref:    (N, H*C) bf16   projected src features (all heads, lane-dense)
    # asrcT_ref: (H, N)   f32    alpha_src per head (src on lane axis)
    # adst_ref:  (TM, H)  f32    alpha_dst for this dst-row tile
    # adj_ref:   (TM, N)  int8   adjacency mask tile, adj[dst, src] (self-loops incl.)
    # b_ref:     (1, D_out)      layer bias
    # out_ref:   (TM, D_out)     D_out = H*C (concat) or C (head mean)
    mask = adj_ref[...] != 0
    neg = jnp.float32(-1e30)

    head_outs = []
    for h in range(heads):          # static unroll over the 8 heads
        a_dst = adst_ref[:, h:h + 1]                    # (TM, 1)
        a_src = asrcT_ref[h:h + 1, :]                   # (1, N)
        s = a_dst + a_src                               # (TM_dst, N_src)
        s = jnp.where(s > 0, s, 0.2 * s)                # LeakyReLU(0.2), PyG default
        s = jnp.where(mask, s, neg)
        m = jnp.max(s, axis=-1, keepdims=True)          # self-loop => finite row max
        p = jnp.exp(s - m)                              # masked entries underflow to 0
        denom = jnp.sum(p, axis=-1, keepdims=True)
        attn = p * pl.reciprocal(denom, approx=True)    # EUP reciprocal
        xw_h = xw_ref[:, h * c_out:(h + 1) * c_out]     # (N, C) bf16
        head_outs.append(
            jnp.dot(attn.astype(jnp.bfloat16), xw_h,
                    preferred_element_type=jnp.float32))  # (TM, C) f32

    if concat:
        # layer-1 epilogue: concat heads (lane-dense) + bias + ELU
        v = jnp.concatenate(head_outs, axis=-1) + b_ref[...]
        out_ref[...] = jnp.where(v > 0, v, jnp.exp(jnp.minimum(v, 0.0)) - 1.0)
    else:
        # layer-2 epilogue: head mean + bias + softmax over classes
        acc = head_outs[0]
        for t in head_outs[1:]:
            acc = acc + t
        v = acc * (1.0 / heads) + b_ref[...]
        mv = jnp.max(v, axis=-1, keepdims=True)
        e = jnp.exp(v - mv)
        out_ref[...] = e * pl.reciprocal(
            jnp.sum(e, axis=-1, keepdims=True), approx=True)


def _gat_attend(xw, asrcT, adst, adj, bias, tm, heads, c_out, concat):
    n = xw.shape[0]
    hc = heads * c_out
    d_out = hc if concat else c_out
    kernel = functools.partial(_gat_attn_kernel,
                               heads=heads, c_out=c_out, concat=concat)
    return pl.pallas_call(
        kernel,
        out_shape=jax.ShapeDtypeStruct((n, d_out), jnp.float32),
        grid=(n // tm,),
        in_specs=[pl.BlockSpec((n, hc), lambda i: (0, 0)),      # xw (all src nodes)
                  pl.BlockSpec((heads, n), lambda i: (0, 0)),   # alpha_src^T
                  pl.BlockSpec((tm, heads), lambda i: (i, 0)),  # alpha_dst tile
                  pl.BlockSpec((tm, n), lambda i: (i, 0)),      # adj tile (int8)
                  pl.BlockSpec((1, d_out), lambda i: (0, 0))],  # bias
        out_specs=pl.BlockSpec((tm, d_out), lambda i: (i, 0)),
        compiler_params=pltpu.CompilerParams(
            dimension_semantics=("parallel",),
            vmem_limit_bytes=48 * 1024 * 1024),   # headroom for v7x (64 MiB phys)
    )(xw, asrcT, adst, adj, bias)


# ----------------------------------------------------------------------------
# One GATConv layer (+ fused activation epilogue)
# ----------------------------------------------------------------------------
def gat_layer(x, w, att_src, att_dst, bias, adj, *, concat, tm=None):
    n, fin = x.shape
    heads, _, c_out = w.shape
    if tm is None:
        tm = n if n <= 256 else 256
    assert n % tm == 0, "row-tile size must divide N in this script"

    # Pack per-head weights lane-dense: w_all[f, h*C + c] = w[h, f, c].
    w_all = jnp.transpose(w, (1, 0, 2)).reshape(fin, heads * c_out)
    # Block-diagonal attention-vector matrices (H, H*C): row h is nonzero only
    # in head h's C columns -> one dot_general yields all per-head alphas.
    eye = jnp.eye(heads, dtype=w.dtype)
    a_src_mat = (att_src[:, 0, :][:, None, :] * eye[:, :, None]).reshape(
        heads, heads * c_out)
    a_dst_mat = (att_dst[:, 0, :][:, None, :] * eye[:, :, None]).reshape(
        heads, heads * c_out)

    xw, asrcT, adst = _gat_project(x, w_all, a_src_mat, a_dst_mat, tm)
    return _gat_attend(xw, asrcT, adst, adj, bias, tm, heads, c_out, concat)


# ----------------------------------------------------------------------------
# Full forward (inference semantics: dropout(p=0.6) is identity in eval mode)
# ----------------------------------------------------------------------------
def pubmed_gat_forward(x, adj, params):
    # TODO(synk): training-mode dropout (p=0.6) not implemented; matches model.eval().
    h1 = gat_layer(x, params["w1"], params["asrc1"], params["adst1"],
                   params["b1"], adj, concat=True)    # (N, H*C1), ELU fused
    h2 = gat_layer(h1, params["w2"], params["asrc2"], params["adst2"],
                   params["b2"], adj, concat=False)   # (N, NCLS), softmax fused
    return h2


if __name__ == "__main__":
    N, FIN, H, C1, NCLS, E = 32, 16, 8, 8, 4, 64

    key = jax.random.PRNGKey(0)
    ks = jax.random.split(key, 10)

    x = jax.random.normal(ks[0], (N, FIN), jnp.float32)

    # synthetic edge_index [2, E] (PyG convention: row 0 = src, row 1 = dst)
    src = jax.random.randint(ks[1], (E,), 0, N)
    dst = jax.random.randint(ks[2], (E,), 0, N)
    adj = jnp.zeros((N, N), jnp.int8).at[dst, src].set(1)
    adj = jnp.maximum(adj, jnp.eye(N, dtype=jnp.int8))   # add_self_loops=True

    def glorot(k, shape, fan_in, fan_out):
        lim = (6.0 / (fan_in + fan_out)) ** 0.5
        return jax.random.uniform(k, shape, jnp.float32, -lim, lim)

    params = dict(
        # conv1: GATConv(in_channels=FIN, out_channels=8, heads=8, concat=True)
        w1=glorot(ks[3], (H, FIN, C1), FIN, H * C1),
        asrc1=glorot(ks[4], (H, 1, C1), C1, 1),
        adst1=glorot(ks[5], (H, 1, C1), C1, 1),
        b1=jnp.zeros((1, H * C1), jnp.float32),
        # conv2: GATConv(in_channels=64, out_channels=NCLS, heads=8, concat=False)
        w2=glorot(ks[6], (H, H * C1, NCLS), H * C1, H * NCLS),
        asrc2=glorot(ks[7], (H, 1, NCLS), NCLS, 1),
        adst2=glorot(ks[8], (H, 1, NCLS), NCLS, 1),
        b2=jnp.zeros((1, NCLS), jnp.float32),
    )

    out = jax.block_until_ready(pubmed_gat_forward(x, adj, params))
    assert out.shape == (N, NCLS)
    assert bool(jnp.all(jnp.isfinite(out)))
    row_sums = jnp.sum(out, axis=-1)
    assert bool(jnp.all(jnp.abs(row_sums - 1.0) < 1e-2))   # softmax rows sum to 1
    print("KERNEL_OK")
</pallas_src>

<mosaic_0001>
module attributes {stable_mosaic.version = 11 : i64} {
  func.func @_gat_project_kernel(%arg0: i32, %arg1: memref<32x16xf32, #tpu.memory_space<vmem>>, %arg2: memref<16x64xf32, #tpu.memory_space<vmem>>, %arg3: memref<8x64xf32, #tpu.memory_space<vmem>>, %arg4: memref<8x64xf32, #tpu.memory_space<vmem>>, %arg5: memref<32x64xbf16, #tpu.memory_space<vmem>>, %arg6: memref<8x32xf32, #tpu.memory_space<vmem>>, %arg7: memref<32x8xf32, #tpu.memory_space<vmem>>) attributes {dimension_semantics = [#tpu.dimension_semantics<parallel>], iteration_bounds = array<i64: 1>, scalar_prefetch = 0 : i64, scratch_operands = 0 : i64, tpu.core_type = #tpu.core_type<tc>, window_params = [{transform_indices = @transform_0, window_bounds = array<i64: 32, 16>}, {pipeline_mode = #tpu.pipeline_mode<synchronous>, transform_indices = @transform_1, window_bounds = array<i64: 16, 64>}, {pipeline_mode = #tpu.pipeline_mode<synchronous>, transform_indices = @transform_2, window_bounds = array<i64: 8, 64>}, {pipeline_mode = #tpu.pipeline_mode<synchronous>, transform_indices = @transform_3, window_bounds = array<i64: 8, 64>}, {transform_indices = @transform_4, window_bounds = array<i64: 32, 64>}, {transform_indices = @transform_5, window_bounds = array<i64: 8, 32>}, {transform_indices = @transform_6, window_bounds = array<i64: 32, 8>}]} {
    %c0 = arith.constant 0 : index
    %c0_0 = arith.constant 0 : index
    %0 = vector.load %arg1[%c0, %c0_0] : memref<32x16xf32, #tpu.memory_space<vmem>>, vector<32x16xf32>
    %c0_1 = arith.constant 0 : index
    %c0_2 = arith.constant 0 : index
    %1 = vector.load %arg2[%c0_1, %c0_2] : memref<16x64xf32, #tpu.memory_space<vmem>>, vector<16x64xf32>
    %cst = arith.constant dense<0.000000e+00> : vector<32x64xf32>
    %2 = tpu.matmul %0, %1, %cst {dimension_numbers = #tpu.dot_dimension_numbers<[1], [0], [0], [1], [0, 0, 1, 1], [], []>} : vector<32x16xf32>, vector<16x64xf32>, vector<32x64xf32> -> vector<32x64xf32>
    %3 = arith.truncf %2 : vector<32x64xf32> to vector<32x64xbf16>
    %c0_3 = arith.constant 0 : index
    %c0_4 = arith.constant 0 : index
    %4 = vector.load %arg5[%c0_3, %c0_4] : memref<32x64xbf16, #tpu.memory_space<vmem>>, vector<32x64xbf16>
    tpu.vector_store %arg5[%c0_3, %c0_4], %3 {strides = array<i32>} : memref<32x64xbf16, #tpu.memory_space<vmem>>, vector<32x64xbf16>,
    %c0_5 = arith.constant 0 : index
    %c0_6 = arith.constant 0 : index
    %5 = vector.load %arg4[%c0_5, %c0_6] : memref<8x64xf32, #tpu.memory_space<vmem>>, vector<8x64xf32>
    %cst_7 = arith.constant dense<0.000000e+00> : vector<32x8xf32>
    %6 = tpu.matmul %2, %5, %cst_7 {dimension_numbers = #tpu.dot_dimension_numbers<[1], [1], [0], [0], [0, 0, 1, 0], [], []>} : vector<32x64xf32>, vector<8x64xf32>, vector<32x8xf32> -> vector<32x8xf32>
    %c0_8 = arith.constant 0 : index
    %c0_9 = arith.constant 0 : index
    %7 = vector.load %arg7[%c0_8, %c0_9] : memref<32x8xf32, #tpu.memory_space<vmem>>, vector<32x8xf32>
    tpu.vector_store %arg7[%c0_8, %c0_9], %6 {strides = array<i32>} : memref<32x8xf32, #tpu.memory_space<vmem>>, vector<32x8xf32>,
    %c0_10 = arith.constant 0 : index
    %c0_11 = arith.constant 0 : index
    %8 = vector.load %arg3[%c0_10, %c0_11] : memref<8x64xf32, #tpu.memory_space<vmem>>, vector<8x64xf32>
    %cst_12 = arith.constant dense<0.000000e+00> : vector<8x32xf32>
    %9 = tpu.matmul %8, %2, %cst_12 {dimension_numbers = #tpu.dot_dimension_numbers<[1], [1], [0], [0], [0, 0, 1, 0], [], []>} : vector<8x64xf32>, vector<32x64xf32>, vector<8x32xf32> -> vector<8x32xf32>
    %c0_13 = arith.constant 0 : index
    %c0_14 = arith.constant 0 : index
    %10 = vector.load %arg6[%c0_13, %c0_14] : memref<8x32xf32, #tpu.memory_space<vmem>>, vector<8x32xf32>
    tpu.vector_store %arg6[%c0_13, %c0_14], %9 {strides = array<i32>} : memref<8x32xf32, #tpu.memory_space<vmem>>, vector<8x32xf32>,
    return
  }
  func.func @transform_0(%arg0: i32) -> (i32, i32) {
    %c0_i32 = arith.constant 0 : i32
    %c0_i32_0 = arith.constant 0 : i32
    return %arg0, %c0_i32 : i32, i32
  }
  func.func @transform_1(%arg0: i32) -> (i32, i32) {
    %c0_i32 = arith.constant 0 : i32
    %c0_i32_0 = arith.constant 0 : i32
    %c0_i32_1 = arith.constant 0 : i32
    return %c0_i32, %c0_i32_0 : i32, i32
  }
  func.func @transform_2(%arg0: i32) -> (i32, i32) {
    %c0_i32 = arith.constant 0 : i32
    %c0_i32_0 = arith.constant 0 : i32
    %c0_i32_1 = arith.constant 0 : i32
    return %c0_i32, %c0_i32_0 : i32, i32
  }
  func.func @transform_3(%arg0: i32) -> (i32, i32) {
    %c0_i32 = arith.constant 0 : i32
    %c0_i32_0 = arith.constant 0 : i32
    %c0_i32_1 = arith.constant 0 : i32
    return %c0_i32, %c0_i32_0 : i32, i32
  }
  func.func @transform_4(%arg0: i32) -> (i32, i32) {
    %c0_i32 = arith.constant 0 : i32
    %c0_i32_0 = arith.constant 0 : i32
    return %arg0, %c0_i32 : i32, i32
  }
  func.func @transform_5(%arg0: i32) -> (i32, i32) {
    %c0_i32 = arith.constant 0 : i32
    %c0_i32_0 = arith.constant 0 : i32
    return %c0_i32, %arg0 : i32, i32
  }
  func.func @transform_6(%arg0: i32) -> (i32, i32) {
    %c0_i32 = arith.constant 0 : i32
    %c0_i32_0 = arith.constant 0 : i32
    return %arg0, %c0_i32 : i32, i32
  }
}

</mosaic_0001>

<bundles_post_ra>
// kernel: tpu_custom_call.1
= control target key start
LH: loop header
LB: loop body
LE: loop exit
PB: predicated region body
PF: predicated region fallthrough
CT: control target
= control target key end

     0   :  { %12 = vsyncpa [#allocation3], 0  ;;  %vm28_vm0 = vcmask 130048   ;;  %vm148_vm1 = vcmask 523264   ;;  %s621_s0 = inlined_call_operand.vmem [shape: f32[32,16], index: 0, kind: input, shape index: {}]   ;;  %s622_s1 = inlined_call_operand.vmem [shape: f32[16,64], index: 1, kind: input, shape index: {}]   ;;  %s623_s2 = inlined_call_operand.vmem [shape: f32[8,64], index: 2, kind: input, shape index: {}]   ;;  %s624_s3 = inlined_call_operand.vmem [shape: f32[8,64], index: 3, kind: input, shape index: {}]   ;;  %s625_s4 = inlined_call_operand.hbm [shape: bf16[32,64], index: 4, kind: output, shape index: {0}]   ;;  %s626_s5 = inlined_call_operand.hbm [shape: f32[8,32], index: 5, kind: output, shape index: {1}]   ;;  %s627_s6 = inlined_call_operand.vmem [shape: f32[32,8], index: 6, kind: output, shape index: {2}]  }
   0x1   :  { %v26_v0 = vld [vmem:[%s622_s1] sm:$0xff]  ;;  %v27_v1 = vld [vmem:[%s622_s1 + $0x8] sm:$0xff] }
   0x2   :  { %v22_v2 = vld [vmem:[%s621_s0] sm:$0xff]  ;;  %v431_v3 = vpack.c.bf16 %v27_v1, %v26_v0 }
   0x3   :  { %406 = vmatprep.mubr.msk.f32.mxu1 %vm28_vm0, %v22_v2  ;;  %v147_v4 = vld [vmem:[%s624_s3] sm:$0xff] }
   0x4   :  { %13 = vsyncpa [#allocation5], 0  ;;  %432 = vmatprep.subr.bf16.mxu1 %v431_v3  ;;  %v23_v5 = vld [vmem:[%s621_s0 + $0x8] sm:$0xff]  ;;  %v24_v6 = vld [vmem:[%s621_s0 + $0x10] sm:$0xff]  ;;  %v498_v8 = vmov 0.0|0.0   ;;  %vm499_vm2 = vmmov 0  }
   0x5   :  { %434 = vmatpush3.bf16.msra.mxu1 %v431_v3  ;;  %v25_v7 = vld [vmem:[%s621_s0 + $0x18] sm:$0xff]  ;;  %435 = vmatprep.subr.bf16.mxu0 %v498_v8  ;;  %v500_v9 = vmov 0.0   ;;  %vm142_vm3 = vcmask 519168   ;;  %vm565_vm4 = vmpackc.low %vm148_vm1, %vm148_vm1  ;;  %v254_v21 = vld [vmem:[%s623_s2] sm:$0xff]  ;;  %s501_s10 = smov [#allocation2]  }
   0x6   :  { %412 = vmatprep.subr.msk.mxu1 %vm148_vm1, %v147_v4  ;;  %428 = vmatprep.mubr.msk.f32.mxu0 %vm499_vm2, %v500_v9  ;;  %s335_s11 = sshll.u32 %s501_s10, 4  ;;  %s336_s11 = int_to_ptr.vmem [resolvable:$true] %s335_s11 }
   0x7   :  { %s450_s12 = scalar_lea.vmem %s336_s11, 256  ;;  %p455_p1 = scmp.lt.s32.totalorder %s336_s11, %s336_s11 }
   0x8   :  { %407 = vmatmul.mubr.msk.f32.vlgmr.msra.gmra.mrb[0].mxu1 %vm28_vm0, %v23_v5  ;;  %p451_p0 = scmp.ne.s32.totalorder %s336_s11, %s450_s12  ;;  %p456_p2 = scmp.lt.s32.totalorder %s450_s12, %s450_s12 }
   0x9   :  { %409 = vmatprep.mubr.msk.f32.mxu1 %vm28_vm0, %v24_v6 }
   0xa   :  { %p457_p3 = por %p456_p2, %p455_p1 }
   0xc   :  { %410 = vmatmul.mubr.msk.f32.gmra.mrb[2].mxu1 %vm28_vm0, %v25_v7  ;;  %p458_p4 = pnand %p457_p3, %p451_p0 }
   0xe   :  { %413 = vmatpush3.xpose.msk.msra.mxu1 %vm148_vm1, %v147_v4 }
  0xdb   :  { %v408_v10 = vpop.f32.mrb[0].mxu1 }
  0xdc   :  { %v383_v11 = vpack.c.bf16 %v408_v10, %v408_v10  ;;  %v107_v12 = vpop.f32.mrb[1].mxu1 }
  0xdd   :  { %v382_v14 = vpack.c.bf16 %v107_v12, %v107_v12  ;;  %v436_v15 = vpack.c.bf16 %v408_v10, %v107_v12  ;;  %414 = vmatprep.mubr.msk.f32.mxu1 %vm148_vm1, %v107_v12 }
  0xde   :  { %144 = vst.msk [vmem:[#allocation2 + $0x4] sm:$0xf] %vm142_vm3, %v383_v11  ;;  %415 = vmatmul.mubr.msk.f32.vlgmr.msra.gmra.mrb[4].mxu1 %vm148_vm1, %v408_v10 }
  0xdf   :  { %143 = vst.msk [vmem:[#allocation2] sm:$0xf] %vm142_vm3, %v382_v14  ;;  %438 = vmatpush3.bf16.xpose.msk.msra.mxu0 %vm565_vm4, %v436_v15  ;;  %v411_v16 = vpop.f32.mrb[2].mxu1 }
  0xe0   :  { %v385_v17 = vpack.c.bf16 %v411_v16, %v411_v16  ;;  %v117_v18 = vpop.f32.mrb[3].mxu1  ;;  %439 = vmatprep.subr.bf16.mxu0 %v498_v8 }
  0xe1   :  { %v384_v19 = vpack.c.bf16 %v117_v18, %v117_v18  ;;  %v440_v20 = vpack.c.bf16 %v411_v16, %v117_v18  ;;  %417 = vmatprep.mubr.msk.f32.mxu1 %vm148_vm1, %v117_v18 }
  0xe2   :  { %146 = vst.msk [vmem:[#allocation2 + $0xc] sm:$0xf] %vm142_vm3, %v385_v17  ;;  %418 = vmatmul.mubr.msk.f32.gmra.mrb[6].mxu1 %vm148_vm1, %v411_v16 }
  0xe3   :  { %145 = vst.msk [vmem:[#allocation2 + $0x8] sm:$0xf] %vm142_vm3, %v384_v19 }
  0xe7   :  { %442 = vmatpush3.bf16.xpose.msk.msra.mxu0 %vm565_vm4, %v440_v20 }
  0xee   :  { %429 = vmatmul.mubr.msk.f32.vlgmr.msra.gmra.mrb[0].mxu0 %vm148_vm1, %v254_v21 }
  0xef   :  { %461 = shalt.err (!%p458_p4)
}
  0xf0   :  { %s462_s15 = scalar_lea.hbm %s625_s4, 256 }
  0xf1   :  { %p463_p5 = scmp.ne.s32.totalorder %s625_s4, %s462_s15  ;;  %p466_p6 = scmp.lt.u32.totalorder %s462_s15, %s625_s4 }
  0xf3   :  { %p468_p7 = pnand %p466_p6, %p463_p5 }
  0xf5   :  { %471 = shalt.err (!%p468_p7)
}
  0xf6   :  { %s502_s19 = smov 64   ;;  %s503_s20 = smov 4   ;;  %vm249_vm5 = vcmask 64512   ;;  %vm328_vm6 = vcmask 261120  }
  0xf7   :  { %341 = dma.vmem_to_hbm [thread:$0]  %s336_s11, 256, %s625_s4, [#allocation3], %s502_s19, %s502_s19, %s503_s20  }
  0xf8   :  { %s504_s4 = smov [#allocation4]  }
  0xf9   :  { %s348_s1 = sshll.u32 %s504_s4, 4  ;;  %s349_s1 = int_to_ptr.vmem [resolvable:$true] %s348_s1 }
  0xfa   :  { %s472_s7 = scalar_lea.vmem %s349_s1, 128  ;;  %p477_p9 = scmp.lt.s32.totalorder %s349_s1, %s349_s1 }
  0xfb   :  { %p473_p8 = scmp.ne.s32.totalorder %s349_s1, %s472_s7  ;;  %p478_p10 = scmp.lt.s32.totalorder %s472_s7, %s472_s7 }
  0xfd   :  { %p479_p11 = por %p478_p10, %p477_p9 }
  0xff   :  { %p480_p12 = pnand %p479_p11, %p473_p8 }
 0x1b1   :  { %v416_v22 = vpop.f32.mrb[4].mxu1 }
 0x1b2   :  { %251 = vst.msk [vmem:[%s627_s6 + $0x8] sm:$0xff] %vm249_vm5, %v416_v22  ;;  %v230_v23 = vpop.f32.mrb[5].mxu1 }
 0x1b3   :  { %250 = vst.msk [vmem:[%s627_s6] sm:$0xff] %vm249_vm5, %v230_v23 }
 0x1b5   :  { %v419_v24 = vpop.f32.mrb[6].mxu1 }
 0x1b6   :  { %253 = vst.msk [vmem:[%s627_s6 + $0x18] sm:$0xff] %vm249_vm5, %v419_v24  ;;  %v240_v25 = vpop.f32.mrb[7].mxu1 }
 0x1b7   :  { %252 = vst.msk [vmem:[%s627_s6 + $0x10] sm:$0xff] %vm249_vm5, %v240_v25 }
 0x1c1   :  { %v324_v26 = vpop.f32.mrb[0].mxu0 }
 0x1c2   :  { %329 = vst.msk [vmem:[#allocation4] sm:$0xff] %vm328_vm6, %v324_v26  ;;  %v430_v27 = vpop.f32.mrb[1].mxu0 }
 0x1c3   :  { %483 = shalt.err (!%p480_p12)
}
 0x1c4   :  { %s484_s0 = scalar_lea.hbm %s626_s5, 128 }
 0x1c5   :  { %p485_p13 = scmp.ne.s32.totalorder %s626_s5, %s484_s0  ;;  %p488_p0 = scmp.lt.u32.totalorder %s484_s0, %s626_s5 }
 0x1c7   :  { %p490_p1 = pnand %p488_p0, %p485_p13 }
 0x1c9   :  { %493 = shalt.err (!%p490_p1)
}
 0x1ca   :  { %351 = dma.vmem_to_hbm [thread:$0]  %s349_s1, 128, %s626_s5, [#allocation5]  }
 0x1cb   :  { %494 = dma.done.wait [#allocation3], 256  }
 0x1cc   :  { %495 = vsyncadd [#allocation3], 4294967040 }
 0x1cd   :  { %496 = dma.done.wait [#allocation5], 128  }
 0x1ce   :  { %497 = vsyncadd [#allocation5], 4294967168 }
 0x1cf   :  { %362 = vsyncpa [#allocation3], 1 }
 0x1d0   :  { %363 = vsyncpa [#allocation5], 1 }

</bundles_post_ra>
